<compile_context>
chip_gen: v7x
topology: tpu7x:2x2x1
jax: 0.10.0
libtpu: 0.0.40
codegen_flags: <defaults>
</compile_context>

<pallas_src>
import jax
import jax.numpy as jnp
from jax.experimental import pallas as pl
from jax.experimental.pallas import tpu as pltpu

IN_DIM = 32 * 32 * 3      # 3072
HIDDEN = 10
OUT = 10
PAD = 128                 # lane-aligned padded width for the tiny (10-wide) dims
MAX_TB = 1024             # batch tile cap (f32 x tile: 12 MiB; x2 buffers = 24 MiB)
VMEM_LIMIT = 48 * 1024 * 1024  # raise scoped VMEM (v5e default 16 MiB); < v7x 64 MiB phys


def _cdiv(a, b):
    return -(-a // b)


def _round_up(a, m):
    return _cdiv(a, m) * m


def _choose_tb(batch):
    """Balanced batch tiles: avoid padding a 513-row batch up to 1024, and
    guarantee >= 2 tiles for mid/large batches so the 'parallel' grid axis
    actually occupies both TensorCores on v7x."""
    n_tiles = _cdiv(batch, MAX_TB)
    if batch > 256:
        n_tiles = max(n_tiles, 2)
    return max(16, _round_up(_cdiv(batch, n_tiles), 16))


def mlp_kernel(x_ref, w1_ref, b1_ref, w2_ref, b2_ref, o_ref):
    # Full forward pass for one batch tile. Kernel is HBM-bound on x; the bf16
    # cast rides the idle VPU slot instead of costing a separate HLO round trip.
    x = x_ref[...].astype(jnp.bfloat16)                     # (TB, 3072) f32 -> bf16
    h = jnp.dot(x, w1_ref[...],                             # bf16 x bf16 -> f32 on MXU
                preferred_element_type=jnp.float32) + b1_ref[...]
    h = jnp.maximum(h, 0.0)                                 # ReLU in f32
    logits = jnp.dot(h.astype(jnp.bfloat16), w2_ref[...],   # bf16 x bf16 -> f32 on MXU
                     preferred_element_type=jnp.float32) + b2_ref[...]
    o_ref[...] = logits.astype(o_ref.dtype)


def pad_params(w1, b1, w2, b2):
    """Pad the tiny 10-wide dims up to 128 lanes ONCE (amortized across calls).
    Padded hidden cols get bias 0 -> ReLU(0)=0; padded W2 rows are 0 so they
    contribute nothing; padded output cols are sliced away in the wrapper."""
    w1p = jnp.zeros((IN_DIM, PAD), jnp.bfloat16).at[:, :HIDDEN].set(
        w1.astype(jnp.bfloat16))
    b1p = jnp.zeros((1, PAD), jnp.float32).at[:, :HIDDEN].set(b1)
    w2p = jnp.zeros((PAD, PAD), jnp.bfloat16).at[:HIDDEN, :OUT].set(
        w2.astype(jnp.bfloat16))
    b2p = jnp.zeros((1, PAD), jnp.float32).at[:, :OUT].set(b2)
    return w1p, b1p, w2p, b2p


def mlp_forward(x, padded_params, tb=None):
    """x: (B, 3, 32, 32) float32. padded_params: output of pad_params.
    Returns logits (B, 10) float32."""
    w1p, b1p, w2p, b2p = padded_params
    B = x.shape[0]
    # nn.Flatten (row-major, matches PyTorch NCHW flatten). Stays f32: contiguous
    # reshape is a free bitcast; the bf16 cast happens inside the kernel.
    x_flat = x.reshape(B, -1)

    tb = _choose_tb(B) if tb is None else max(16, _round_up(tb, 16))
    n_tiles = _cdiv(B, tb)   # ragged final block handled by Pallas (no global pad)

    out_padded = pl.pallas_call(
        mlp_kernel,
        out_shape=jax.ShapeDtypeStruct((B, PAD), jnp.float32),
        grid=(n_tiles,),
        in_specs=[
            # x: batch-tiled, double-buffered so DMA overlaps the MXU work.
            pl.BlockSpec((tb, IN_DIM), lambda i: (i, 0)),
            # Weights/biases: constant block index -> fetched once, VMEM-resident;
            # single-buffered to avoid paying 2x VMEM for data that never changes.
            pl.BlockSpec((IN_DIM, PAD), lambda i: (0, 0), pipeline_mode=pl.Buffered(1)),
            pl.BlockSpec((1, PAD), lambda i: (0, 0), pipeline_mode=pl.Buffered(1)),
            pl.BlockSpec((PAD, PAD), lambda i: (0, 0), pipeline_mode=pl.Buffered(1)),
            pl.BlockSpec((1, PAD), lambda i: (0, 0), pipeline_mode=pl.Buffered(1)),
        ],
        out_specs=pl.BlockSpec((tb, PAD), lambda i: (i, 0)),   # lane-dense output
        compiler_params=pltpu.CompilerParams(
            dimension_semantics=("parallel",),                 # megacore split on v7x
            vmem_limit_bytes=VMEM_LIMIT),
    )(x_flat, w1p, b1p, w2p, b2p)
    # Only the column slice remains (rows already exact). Fuse the consumer
    # (loss/argmax) on top of this under jit to eliminate this copy too.
    return out_padded[:, :OUT]


def init_params(key):
    """Deterministic init mirroring nn.Linear's U(-1/sqrt(fan_in), 1/sqrt(fan_in))."""
    k1, k2, k3, k4 = jax.random.split(key, 4)
    bound1 = 1.0 / jnp.sqrt(float(IN_DIM))
    bound2 = 1.0 / jnp.sqrt(float(HIDDEN))
    w1 = jax.random.uniform(k1, (IN_DIM, HIDDEN), jnp.float32, -bound1, bound1)
    b1 = jax.random.uniform(k2, (1, HIDDEN), jnp.float32, -bound1, bound1)
    w2 = jax.random.uniform(k3, (HIDDEN, OUT), jnp.float32, -bound2, bound2)
    b2 = jax.random.uniform(k4, (1, OUT), jnp.float32, -bound2, bound2)
    return w1, b1, w2, b2


def _reference(x, w1, b1, w2, b2):
    """Pure-JAX reference mirroring the kernel's bf16 MXU feed (f32 accumulation)."""
    B = x.shape[0]
    xb = x.reshape(B, -1).astype(jnp.bfloat16)
    h = jnp.dot(xb, w1.astype(jnp.bfloat16),
                preferred_element_type=jnp.float32) + b1
    h = jnp.maximum(h, 0.0)
    return jnp.dot(h.astype(jnp.bfloat16), w2.astype(jnp.bfloat16),
                   preferred_element_type=jnp.float32) + b2


if __name__ == "__main__":
    key = jax.random.PRNGKey(0)
    kx, kp = jax.random.split(key)

    w1, b1, w2, b2 = init_params(kp)
    padded = pad_params(w1, b1, w2, b2)   # padded once, reused across calls

    # Small batch (module's natural CIFAR-style NCHW input shape).
    B = 2
    x = jax.random.normal(kx, (B, 3, 32, 32), jnp.float32)
    fwd = jax.jit(lambda xs: mlp_forward(xs, padded))
    logits = jax.block_until_ready(fwd(x))
    ref = _reference(x, w1, b1, w2, b2)
    assert logits.shape == (B, OUT)
    assert jnp.allclose(logits, ref, atol=2e-3, rtol=2e-3)

    # Exercise multi-tile grid + ragged final block (B=20, tb=16 -> grid=(2,),
    # last block has 4 real rows; no wrapper-side batch padding).
    B2 = 20
    x2 = jax.random.normal(jax.random.PRNGKey(3), (B2, 3, 32, 32), jnp.float32)
    fwd2 = jax.jit(lambda xs: mlp_forward(xs, padded, tb=16))
    logits2 = jax.block_until_ready(fwd2(x2))
    ref2 = _reference(x2, w1, b1, w2, b2)
    assert logits2.shape == (B2, OUT)
    assert jnp.allclose(logits2, ref2, atol=2e-3, rtol=2e-3)

    print("KERNEL_OK")
</pallas_src>

<mosaic_0001>
module attributes {stable_mosaic.version = 11 : i64} {
  func.func @mlp_kernel(%arg0: i32, %arg1: memref<16x3072xf32, #tpu.memory_space<vmem>>, %arg2: memref<3072x128xbf16, #tpu.memory_space<vmem>>, %arg3: memref<1x128xf32, #tpu.memory_space<vmem>>, %arg4: memref<128x128xbf16, #tpu.memory_space<vmem>>, %arg5: memref<1x128xf32, #tpu.memory_space<vmem>>, %arg6: memref<16x128xf32, #tpu.memory_space<vmem>>) attributes {dimension_semantics = [#tpu.dimension_semantics<parallel>], iteration_bounds = array<i64: 1>, scalar_prefetch = 0 : i64, scratch_operands = 0 : i64, tpu.core_type = #tpu.core_type<tc>, window_params = [{transform_indices = @transform_0, window_bounds = array<i64: 16, 3072>}, {pipeline_mode = #tpu.pipeline_mode<synchronous>, transform_indices = @transform_1, window_bounds = array<i64: 3072, 128>}, {pipeline_mode = #tpu.pipeline_mode<synchronous>, transform_indices = @transform_2, window_bounds = array<i64: 1, 128>}, {pipeline_mode = #tpu.pipeline_mode<synchronous>, transform_indices = @transform_3, window_bounds = array<i64: 128, 128>}, {pipeline_mode = #tpu.pipeline_mode<synchronous>, transform_indices = @transform_4, window_bounds = array<i64: 1, 128>}, {transform_indices = @transform_5, window_bounds = array<i64: 16, 128>}]} {
    %c0 = arith.constant 0 : index
    %c0_0 = arith.constant 0 : index
    %0 = vector.load %arg1[%c0, %c0_0] : memref<16x3072xf32, #tpu.memory_space<vmem>>, vector<16x3072xf32>
    %1 = arith.truncf %0 : vector<16x3072xf32> to vector<16x3072xbf16>
    %c0_1 = arith.constant 0 : index
    %c0_2 = arith.constant 0 : index
    %2 = vector.load %arg2[%c0_1, %c0_2] : memref<3072x128xbf16, #tpu.memory_space<vmem>>, vector<3072x128xbf16>
    %cst = arith.constant dense<0.000000e+00> : vector<16x128xf32>
    %3 = tpu.matmul %1, %2, %cst {dimension_numbers = #tpu.dot_dimension_numbers<[1], [0], [0], [1], [0, 0, 1, 1], [], []>} : vector<16x3072xbf16>, vector<3072x128xbf16>, vector<16x128xf32> -> vector<16x128xf32>
    %c0_3 = arith.constant 0 : index
    %c0_4 = arith.constant 0 : index
    %4 = vector.load %arg3[%c0_3, %c0_4] : memref<1x128xf32, #tpu.memory_space<vmem>>, vector<1x128xf32>
    %5 = vector.broadcast %4 : vector<1x128xf32> to vector<16x128xf32>
    %6 = arith.addf %3, %5 : vector<16x128xf32>
    %cst_5 = arith.constant 0.000000e+00 : f32
    %7 = vector.broadcast %cst_5 : f32 to vector<16x128xf32>
    %8 = arith.maximumf %6, %7 : vector<16x128xf32>
    %9 = arith.truncf %8 : vector<16x128xf32> to vector<16x128xbf16>
    %c0_6 = arith.constant 0 : index
    %c0_7 = arith.constant 0 : index
    %10 = vector.load %arg4[%c0_6, %c0_7] : memref<128x128xbf16, #tpu.memory_space<vmem>>, vector<128x128xbf16>
    %cst_8 = arith.constant dense<0.000000e+00> : vector<16x128xf32>
    %11 = tpu.matmul %9, %10, %cst_8 {dimension_numbers = #tpu.dot_dimension_numbers<[1], [0], [0], [1], [0, 0, 1, 1], [], []>} : vector<16x128xbf16>, vector<128x128xbf16>, vector<16x128xf32> -> vector<16x128xf32>
    %c0_9 = arith.constant 0 : index
    %c0_10 = arith.constant 0 : index
    %12 = vector.load %arg5[%c0_9, %c0_10] : memref<1x128xf32, #tpu.memory_space<vmem>>, vector<1x128xf32>
    %13 = vector.broadcast %12 : vector<1x128xf32> to vector<16x128xf32>
    %14 = arith.addf %11, %13 : vector<16x128xf32>
    %c0_11 = arith.constant 0 : index
    %c0_12 = arith.constant 0 : index
    %15 = vector.load %arg6[%c0_11, %c0_12] : memref<16x128xf32, #tpu.memory_space<vmem>>, vector<16x128xf32>
    tpu.vector_store %arg6[%c0_11, %c0_12], %14 {strides = array<i32>} : memref<16x128xf32, #tpu.memory_space<vmem>>, vector<16x128xf32>,
    return
  }
  func.func @transform_0(%arg0: i32) -> (i32, i32) {
    %c0_i32 = arith.constant 0 : i32
    %c0_i32_0 = arith.constant 0 : i32
    return %arg0, %c0_i32 : i32, i32
  }
  func.func @transform_1(%arg0: i32) -> (i32, i32) {
    %c0_i32 = arith.constant 0 : i32
    %c0_i32_0 = arith.constant 0 : i32
    %c0_i32_1 = arith.constant 0 : i32
    return %c0_i32, %c0_i32_0 : i32, i32
  }
  func.func @transform_2(%arg0: i32) -> (i32, i32) {
    %c0_i32 = arith.constant 0 : i32
    %c0_i32_0 = arith.constant 0 : i32
    %c0_i32_1 = arith.constant 0 : i32
    return %c0_i32, %c0_i32_0 : i32, i32
  }
  func.func @transform_3(%arg0: i32) -> (i32, i32) {
    %c0_i32 = arith.constant 0 : i32
    %c0_i32_0 = arith.constant 0 : i32
    %c0_i32_1 = arith.constant 0 : i32
    return %c0_i32, %c0_i32_0 : i32, i32
  }
  func.func @transform_4(%arg0: i32) -> (i32, i32) {
    %c0_i32 = arith.constant 0 : i32
    %c0_i32_0 = arith.constant 0 : i32
    %c0_i32_1 = arith.constant 0 : i32
    return %c0_i32, %c0_i32_0 : i32, i32
  }
  func.func @transform_5(%arg0: i32) -> (i32, i32) {
    %c0_i32 = arith.constant 0 : i32
    %c0_i32_0 = arith.constant 0 : i32
    return %arg0, %c0_i32 : i32, i32
  }
}

</mosaic_0001>

<bundles_post_ra>
// kernel: _lambda_.1
= control target key start
LH: loop header
LB: loop body
LE: loop exit
PB: predicated region body
PF: predicated region fallthrough
CT: control target
= control target key end

     0   :  { %10 = vsyncpa [#allocation3], 0  ;;  %s3916_s0 = inlined_call_operand.vmem [shape: f32[2,3072], index: 0, kind: input, shape index: {}]   ;;  %s3917_s1 = inlined_call_operand.hbm [shape: bf16[3072,128], index: 1, kind: input, shape index: {}]   ;;  %s3918_s2 = inlined_call_operand.vmem [shape: f32[1,128], index: 2, kind: input, shape index: {}]   ;;  %s3919_s3 = inlined_call_operand.vmem [shape: bf16[128,128], index: 3, kind: input, shape index: {}]   ;;  %s3920_s4 = inlined_call_operand.vmem [shape: f32[1,128], index: 4, kind: input, shape index: {}]   ;;  %s3921_s5 = inlined_call_operand.hbm [shape: f32[2,128], index: 5, kind: output, shape index: {}]  }
   0x1   :  { %11 = vsyncpa [#allocation4], 0  ;;  %s3629_s18 = smov [#allocation2]   ;;  %s3581_s22 = scalar_lea.hbm %s3917_s1, 24576 }
   0x2   :  { %s19_s19 = sshll.u32 %s3629_s18, 4  ;;  %p3582_p0 = scmp.ne.s32.totalorder %s3917_s1, %s3581_s22  ;;  %s20_s19 = int_to_ptr.vmem [resolvable:$true] %s19_s19 }
   0x3   :  { %p3585_p1 = scmp.lt.u32.totalorder %s3581_s22, %s3917_s1 }
   0x5   :  { %p3587_p2 = pnand %p3585_p1, %p3582_p0 }
   0x7   :  { %3590 = shalt.err (!%p3587_p2)
}
   0x8   :  { %s3591_s27 = scalar_lea.vmem %s20_s19, 24576  ;;  %p3596_p4 = scmp.lt.s32.totalorder %s20_s19, %s20_s19 }
   0x9   :  { %p3592_p3 = scmp.ne.s32.totalorder %s20_s19, %s3591_s27  ;;  %p3597_p5 = scmp.lt.s32.totalorder %s3591_s27, %s3591_s27 }
   0xb   :  { %p3598_p6 = por %p3597_p5, %p3596_p4 }
   0xd   :  { %p3599_p7 = pnand %p3598_p6, %p3592_p3 }
   0xf   :  { %3602 = shalt.err (!%p3599_p7)
}
  0x10   :  { %s3630_s28 = smov 64   ;;  %s3631_s29 = smov 4  }
  0x11   :  { %25 = dma.hbm_to_vmem [thread:$0]  %s3917_s1, 24576, %s20_s19, [#allocation3], %s3630_s28, %s3630_s28, %s3631_s29  }
  0x12   :  { %3625 = dma.done.wait [#allocation3], 24576  }
  0x13   :  { %3626 = vsyncadd [#allocation3], 4294942720  ;;  %v3309_v0 = vld [vmem:[#allocation2 + $0x40] sm:$0xff]   ;;  %v3313_v4 = vld [vmem:[#allocation2 + $0x48] sm:$0xff]   ;;  %v3632_v25 = vmov 1983009808   ;;  %v139_v27 = vlaneseq }
  0x14   :  { %v3310_v1 = vld [vmem:[#allocation2 + $0xc0] sm:$0xff]   ;;  %3007 = vmatprep.subr.bf16.mxu0 %v3309_v0  ;;  %v3314_v5 = vld [vmem:[#allocation2 + $0xc8] sm:$0xff]   ;;  %v3317_v8 = vld [vmem:[#allocation2 + $0x50] sm:$0xff]   ;;  %v137_v26 = vunpack.c.l.s4 %v3632_v25  ;;  %vm3634_vm0 = vmmov 0  }
  0x15   :  { %v3311_v2 = vld [vmem:[#allocation2] sm:$0xff]   ;;  %3029 = vmatprep.subr.bf16.mxu1 %v3310_v1  ;;  %v3315_v6 = vld [vmem:[#allocation2 + $0x8] sm:$0xff]   ;;  %v3318_v9 = vld [vmem:[#allocation2 + $0xd0] sm:$0xff]   ;;  %v140_v33 = vshrl.u32 %v139_v27, 7 }
  0x16   :  { %v3312_v3 = vld [vmem:[#allocation2 + $0x80] sm:$0xff]   ;;  %3008 = vmatpush3.bf16.msra.mxu0 %v3311_v2  ;;  %v3316_v7 = vld [vmem:[#allocation2 + $0x88] sm:$0xff]   ;;  %v3319_v10 = vld [vmem:[#allocation2 + $0x10] sm:$0xff]   ;;  %v138_v32 = vunpack.c.0.s8 %v137_v26 }
  0x17   :  { %3030 = vmatpush3.bf16.msra.mxu1 %v3312_v3  ;;  %3009 = vmatprep.subr.bf16.mxu0 %v3313_v4  ;;  %v3320_v11 = vld [vmem:[#allocation2 + $0x90] sm:$0xff]   ;;  %v3321_v12 = vld [vmem:[#allocation2 + $0x58] sm:$0xff]   ;;  %v3325_v16 = vld [vmem:[#allocation2 + $0x60] sm:$0xff]  }
  0x18   :  { %3031 = vmatprep.subr.bf16.mxu1 %v3314_v5  ;;  %v3322_v13 = vld [vmem:[#allocation2 + $0xd8] sm:$0xff]   ;;  %v3326_v17 = vld [vmem:[#allocation2 + $0xe0] sm:$0xff]   ;;  %v3329_v20 = vld [vmem:[#allocation2 + $0x68] sm:$0xff]   ;;  %v3680_v37 = vsub.s32 %v138_v32, %v140_v33 }
  0x19   :  { %v3323_v14 = vld [vmem:[#allocation2 + $0x18] sm:$0xff]   ;;  %v3327_v18 = vld [vmem:[#allocation2 + $0x20] sm:$0xff]   ;;  %v3330_v21 = vld [vmem:[#allocation2 + $0xe8] sm:$0xff]  }
  0x1a   :  { %3010 = vmatpush3.bf16.msra.mxu0 %v3315_v6  ;;  %v3324_v15 = vld [vmem:[#allocation2 + $0x98] sm:$0xff]   ;;  %v3328_v19 = vld [vmem:[#allocation2 + $0xa0] sm:$0xff]   ;;  %v3331_v22 = vld [vmem:[#allocation2 + $0x28] sm:$0xff]  }
  0x1b   :  { %3032 = vmatpush3.bf16.msra.mxu1 %v3316_v7  ;;  %3011 = vmatprep.subr.bf16.mxu0 %v3317_v8  ;;  %v3332_v23 = vld [vmem:[#allocation2 + $0xa8] sm:$0xff]   ;;  %v3333_v24 = vld [vmem:[#allocation2 + $0x70] sm:$0xff]   ;;  %v3337_v31 = vld [vmem:[#allocation2 + $0x78] sm:$0xff]  }
  0x1c   :  { %3033 = vmatprep.subr.bf16.mxu1 %v3318_v9  ;;  %v3334_v28 = vld [vmem:[#allocation2 + $0xf0] sm:$0xff]   ;;  %v3338_v34 = vld [vmem:[#allocation2 + $0xf8] sm:$0xff]   ;;  %v3353_v53 = vld [vmem:[#allocation2 + $0x140] sm:$0xff]  }
  0x1d   :  { %v3335_v29 = vld [vmem:[#allocation2 + $0x30] sm:$0xff]   ;;  %v3339_v35 = vld [vmem:[#allocation2 + $0x38] sm:$0xff]   ;;  %v3354_v58 = vld [vmem:[#allocation2 + $0x1c0] sm:$0xff]  }
  0x1e   :  { %3012 = vmatpush3.bf16.msra.mxu0 %v3319_v10  ;;  %v3336_v30 = vld [vmem:[#allocation2 + $0xb0] sm:$0xff]   ;;  %v3340_v36 = vld [vmem:[#allocation2 + $0xb8] sm:$0xff]   ;;  %v3355_v62 = vld [vmem:[#allocation2 + $0x100] sm:$0xff]  }
  0x1f   :  { %3034 = vmatpush3.bf16.msra.mxu1 %v3320_v11  ;;  %3013 = vmatprep.subr.bf16.mxu0 %v3321_v12  ;;  %v3341_v38 = vld [vmem:[%s3916_s0] ss:$48 sps:$4 sm:$0xff]   ;;  %v3349_v43 = vld [vmem:[%s3916_s0 + $0x4] ss:$48 sps:$4 sm:$0xff]   ;;  %v3357_v4 = vld [vmem:[#allocation2 + $0x148] sm:$0xff]  }
  0x20   :  { %3035 = vmatprep.subr.bf16.mxu1 %v3322_v13  ;;  %v3343_v39 = vld [vmem:[%s3916_s0 + $0x60] ss:$48 sps:$4 sm:$0xff]   ;;  %v142_v42 = vrot.slane %v3341_v38, %v3680_v37  ;;  %v3350_v44 = vld [vmem:[%s3916_s0 + $0x64] ss:$48 sps:$4 sm:$0xff]   ;;  %v149_v50 = vrot.slane %v3349_v43, %v3680_v37  ;;  %v3358_v7 = vld [vmem:[#allocation2 + $0x1c8] sm:$0xff]  }
  0x21   :  { %v3345_v40 = vld [vmem:[%s3916_s0 + $0xc0] ss:$48 sps:$4 sm:$0xff]   ;;  %v3351_v45 = vld [vmem:[%s3916_s0 + $0xc4] ss:$48 sps:$4 sm:$0xff]   ;;  %v156_v46 = vrot.slane %v3343_v39, %v3680_v37  ;;  %v163_v51 = vrot.slane %v3350_v44, %v3680_v37  ;;  %v3359_v8 = vld [vmem:[#allocation2 + $0x108] sm:$0xff]  }
  0x22   :  { %3014 = vmatpush3.bf16.msra.mxu0 %v3323_v14  ;;  %v3347_v41 = vld [vmem:[%s3916_s0 + $0x120] ss:$48 sps:$4 sm:$0xff]   ;;  %v358_v47 = vrot.slane %v3345_v40, %v3680_v37  ;;  %v3352_v49 = vld [vmem:[%s3916_s0 + $0x124] ss:$48 sps:$4 sm:$0xff]   ;;  %v365_v52 = vrot.slane %v3351_v45, %v3680_v37  ;;  %v3360_v9 = vld [vmem:[#allocation2 + $0x188] sm:$0xff]  }
  0x23   :  { %3036 = vmatpush3.bf16.msra.mxu1 %v3324_v15  ;;  %3015 = vmatprep.subr.bf16.mxu0 %v3325_v16  ;;  %v372_v48 = vrot.slane %v3347_v41, %v3680_v37  ;;  %v165_v54 = vcombine.high %v142_v42, %v156_v46  ;;  %v379_v56 = vrot.slane %v3352_v49, %v3680_v37  ;;  %v3356_v2 = vld [vmem:[#allocation2 + $0x180] sm:$0xff]   ;;  %v3361_v10 = vld [vmem:[#allocation2 + $0x150] sm:$0xff]   ;;  %v3365_v14 = vld [vmem:[#allocation2 + $0x158] sm:$0xff]  }
  0x24   :  { %3037 = vmatprep.subr.bf16.mxu1 %v3326_v17  ;;  %v164_v57 = vcombine.low %v142_v42, %v156_v46  ;;  %v167_v59 = vcombine.high %v149_v50, %v163_v51  ;;  %v166_v61 = vcombine.low %v149_v50, %v163_v51  ;;  %v3362_v11 = vld [vmem:[#allocation2 + $0x1d0] sm:$0xff]   ;;  %v3366_v15 = vld [vmem:[#allocation2 + $0x1d8] sm:$0xff]   ;;  %v3376_v25 = vld [vmem:[#allocation2 + $0x1a8] sm:$0xff]  }
  0x25   :  { %v381_v55 = vcombine.high %v358_v47, %v372_v48  ;;  %v380_v60 = vcombine.low %v358_v47, %v372_v48  ;;  %v383_v0 = vcombine.high %v365_v52, %v379_v56  ;;  %v382_v1 = vcombine.low %v365_v52, %v379_v56  ;;  %v3363_v12 = vld [vmem:[#allocation2 + $0x110] sm:$0xff]   ;;  %v3367_v16 = vld [vmem:[#allocation2 + $0x118] sm:$0xff]   ;;  %v3397_v49 = vld [vmem:[#allocation2 + $0x240] sm:$0xff]  }
  0x26   :  { %3016 = vmatpush3.bf16.msra.mxu0 %v3327_v18  ;;  %v3364_v13 = vld [vmem:[#allocation2 + $0x190] sm:$0xff]   ;;  %v3368_v17 = vld [vmem:[#allocation2 + $0x198] sm:$0xff]   ;;  %v3369_v18 = vld [vmem:[#allocation2 + $0x160] sm:$0xff]  }
  0x27   :  { %3038 = vmatpush3.bf16.msra.mxu1 %v3328_v19  ;;  %3017 = vmatprep.subr.bf16.mxu0 %v3329_v20  ;;  %v613_v63 = vpack.c.bf16 %v381_v55, %v165_v54  ;;  %v612_v3 = vpack.c.bf16 %v380_v60, %v164_v57  ;;  %v615_v5 = vpack.c.bf16 %v383_v0, %v167_v59  ;;  %v3370_v19 = vld [vmem:[#allocation2 + $0x1e0] sm:$0xff]   ;;  %v3377_v26 = vld [vmem:[#allocation2 + $0x170] sm:$0xff]   ;;  %v3383_v32 = vld [vmem:[#allocation2 + $0x138] sm:$0xff]  }
  0x28   :  { %3039 = vmatprep.subr.bf16.mxu1 %v3330_v21  ;;  %v614_v6 = vpack.c.bf16 %v382_v1, %v166_v61  ;;  %v3371_v20 = vld [vmem:[#allocation2 + $0x120] sm:$0xff]   ;;  %v3378_v27 = vld [vmem:[#allocation2 + $0x1f0] sm:$0xff]   ;;  %v3384_v33 = vld [vmem:[#allocation2 + $0x1b8] sm:$0xff]  }
  0x29   :  { %2211 = vmatprep.mubr.bf16.mxu0 %v613_v63  ;;  %2252 = vmatprep.mubr.bf16.mxu1 %v615_v5  ;;  %v3372_v21 = vld [vmem:[#allocation2 + $0x1a0] sm:$0xff]   ;;  %v3391_v38 = vld [vmem:[%s3916_s0 + $0x128] ss:$48 sps:$4 sm:$0xff]   ;;  %v3393_v39 = vld [vmem:[%s3916_s0 + $0xc] ss:$48 sps:$4 sm:$0xff]  }
  0x2a   :  { %3018 = vmatpush3.bf16.msra.mxu0 %v3331_v22  ;;  %v3373_v22 = vld [vmem:[#allocation2 + $0x168] sm:$0xff]   ;;  %v408_v46 = vrot.slane %v3391_v38, %v3680_v37  ;;  %v185_v47 = vrot.slane %v3393_v39, %v3680_v37  ;;  %v3398_v54 = vld [vmem:[#allocation2 + $0x2c0] sm:$0xff]  }
  0x2b   :  { %3040 = vmatpush3.bf16.msra.mxu1 %v3332_v23  ;;  %3019 = vmatprep.subr.bf16.mxu0 %v3333_v24  ;;  %v3374_v23 = vld [vmem:[#allocation2 + $0x1e8] sm:$0xff]   ;;  %v3399_v59 = vld [vmem:[#allocation2 + $0x200] sm:$0xff]  }
  0x2c   :  { %3041 = vmatprep.subr.bf16.mxu1 %v3334_v28  ;;  %v3375_v24 = vld [vmem:[#allocation2 + $0x128] sm:$0xff]   ;;  %v3379_v28 = vld [vmem:[#allocation2 + $0x130] sm:$0xff]  }
  0x2d   :  { %v3394_v40 = vld [vmem:[%s3916_s0 + $0x6c] ss:$48 sps:$4 sm:$0xff]   ;;  %v3438_v39 = vld [vmem:[%s3916_s0 + $0x74] ss:$48 sps:$4 sm:$0xff]  }
  0x2e   :  { %3020 = vmatpush3.bf16.msra.mxu0 %v3335_v29  ;;  %v3380_v29 = vld [vmem:[#allocation2 + $0x1b0] sm:$0xff]   ;;  %v3395_v44 = vld [vmem:[%s3916_s0 + $0xcc] ss:$48 sps:$4 sm:$0xff]   ;;  %v199_v48 = vrot.slane %v3394_v40, %v3680_v37 }
  0x2f   :  { %3042 = vmatpush3.bf16.msra.mxu1 %v3336_v30  ;;  %3021 = vmatprep.subr.bf16.mxu0 %v3337_v31  ;;  %v3381_v30 = vld [vmem:[#allocation2 + $0x178] sm:$0xff]   ;;  %v401_v51 = vrot.slane %v3395_v44, %v3680_v37  ;;  %v3401_v1 = vld [vmem:[#allocation2 + $0x248] sm:$0xff]   ;;  %v3439_v40 = vld [vmem:[%s3916_s0 + $0xd4] ss:$48 sps:$4 sm:$0xff]  }
  0x30   :  { %3043 = vmatprep.subr.bf16.mxu1 %v3338_v34  ;;  %v3382_v31 = vld [vmem:[#allocation2 + $0x1f8] sm:$0xff]   ;;  %v203_v56 = vcombine.high %v185_v47, %v199_v48  ;;  %v3403_v5 = vld [vmem:[#allocation2 + $0x208] sm:$0xff]  }
  0x31   :  { %v3385_v34 = vld [vmem:[%s3916_s0 + $0x8] ss:$48 sps:$4 sm:$0xff]   ;;  %v3396_v45 = vld [vmem:[%s3916_s0 + $0x12c] ss:$48 sps:$4 sm:$0xff]  }
  0x32   :  { %3022 = vmatpush3.bf16.msra.mxu0 %v3339_v35  ;;  %v3387_v35 = vld [vmem:[%s3916_s0 + $0x68] ss:$48 sps:$4 sm:$0xff]   ;;  %v178_v41 = vrot.slane %v3385_v34, %v3680_v37  ;;  %v415_v52 = vrot.slane %v3396_v45, %v3680_v37  ;;  %v3435_v34 = vld [vmem:[%s3916_s0 + $0x130] ss:$48 sps:$4 sm:$0xff]  }
  0x33   :  { %3044 = vmatpush3.bf16.msra.mxu1 %v3340_v36  ;;  %3051 = vmatprep.subr.bf16.mxu0 %v3353_v53  ;;  %v3389_v36 = vld [vmem:[%s3916_s0 + $0xc8] ss:$48 sps:$4 sm:$0xff]   ;;  %v192_v42 = vrot.slane %v3387_v35, %v3680_v37  ;;  %v3437_v35 = vld [vmem:[%s3916_s0 + $0x14] ss:$48 sps:$4 sm:$0xff]  }
  0x34   :  { %3073 = vmatprep.subr.bf16.mxu1 %v3354_v58  ;;  %v394_v43 = vrot.slane %v3389_v36, %v3680_v37  ;;  %v202_v58 = vcombine.low %v185_v47, %v199_v48  ;;  %v419_v60 = vcombine.high %v401_v51, %v415_v52  ;;  %v418_v61 = vcombine.low %v401_v51, %v415_v52  ;;  %v3441_v45 = vld [vmem:[#allocation2 + $0x340] sm:$0xff]  }
  0x35   :  { %2212 = vmatmul.mubr.bf16.vlgmr.msra.gmra.mrb[0].mxu0 %v612_v3  ;;  %v201_v50 = vcombine.high %v178_v41, %v192_v42  ;;  %v200_v53 = vcombine.low %v178_v41, %v192_v42  ;;  %v3440_v41 = vld [vmem:[%s3916_s0 + $0x134] ss:$48 sps:$4 sm:$0xff]   ;;  %v221_v44 = vrot.slane %v3437_v35, %v3680_v37  ;;  %v235_v47 = vrot.slane %v3438_v39, %v3680_v37  ;;  %v3483_v35 = vld [vmem:[%s3916_s0 + $0xdc] ss:$48 sps:$4 sm:$0xff]  }
  0x36   :  { %3052 = vmatpush3.bf16.msra.mxu0 %v3355_v62  ;;  %2253 = vmatmul.mubr.bf16.vlgmr.msra.gmra.mrb[0].mxu1 %v614_v6  ;;  %v417_v55 = vcombine.high %v394_v43, %v408_v46  ;;  %v416_v57 = vcombine.low %v394_v43, %v408_v46  ;;  %v3400_v62 = vld [vmem:[#allocation2 + $0x280] sm:$0xff]   ;;  %v618_v3 = vpack.c.bf16 %v418_v61, %v202_v58  ;;  %v3404_v6 = vld [vmem:[#allocation2 + $0x288] sm:$0xff]  }
  0x37   :  { %3053 = vmatprep.subr.bf16.mxu0 %v3357_v4  ;;  %3074 = vmatpush3.bf16.msra.mxu1 %v3356_v2  ;;  %v619_v2 = vpack.c.bf16 %v419_v60, %v203_v56  ;;  %v3402_v4 = vld [vmem:[#allocation2 + $0x2c8] sm:$0xff]   ;;  %v444_v43 = vrot.slane %v3435_v34, %v3680_v37  ;;  %v437_v48 = vrot.slane %v3439_v40, %v3680_v37 }
  0x38   :  { %3075 = vmatprep.subr.bf16.mxu1 %v3358_v7  ;;  %v617_v63 = vpack.c.bf16 %v417_v55, %v201_v50  ;;  %v616_v0 = vpack.c.bf16 %v416_v57, %v200_v53  ;;  %v3405_v7 = vld [vmem:[#allocation2 + $0x250] sm:$0xff]   ;;  %v3442_v50 = vld [vmem:[#allocation2 + $0x3c0] sm:$0xff]   ;;  %v239_v55 = vcombine.high %v221_v44, %v235_v47  ;;  %v238_v57 = vcombine.low %v221_v44, %v235_v47  ;;  %v3482_v34 = vld [vmem:[%s3916_s0 + $0x7c] ss:$48 sps:$4 sm:$0xff]  }
  0x39   :  { %2334 = vmatprep.mubr.bf16.mxu1 %v619_v2  ;;  %v3447_v2 = vld [vmem:[#allocation2 + $0x308] sm:$0xff]   ;;  %v3485_v44 = vld [vmem:[#allocation2 + $0x440] sm:$0xff]  }
  0x3a   :  { %3054 = vmatpush3.bf16.msra.mxu0 %v3359_v8  ;;  %2293 = vmatprep.mubr.bf16.mxu0 %v617_v63  ;;  %v3406_v8 = vld [vmem:[#allocation2 + $0x2d0] sm:$0xff]   ;;  %v3484_v40 = vld [vmem:[%s3916_s0 + $0x13c] ss:$48 sps:$4 sm:$0xff]  }
  0x3b   :  { %3055 = vmatprep.subr.bf16.mxu0 %v3361_v10  ;;  %3076 = vmatpush3.bf16.msra.mxu1 %v3360_v9  ;;  %v3407_v9 = vld [vmem:[#allocation2 + $0x210] sm:$0xff]   ;;  %v487_v47 = vrot.slane %v3484_v40, %v3680_v37  ;;  %v3529_v40 = vld [vmem:[#allocation2 + $0x540] sm:$0xff]  }
  0x3c   :  { %3077 = vmatprep.subr.bf16.mxu1 %v3362_v11  ;;  %v3408_v10 = vld [vmem:[#allocation2 + $0x290] sm:$0xff]   ;;  %v3409_v11 = vld [vmem:[#allocation2 + $0x258] sm:$0xff]  }
  0x3e   :  { %3056 = vmatpush3.bf16.msra.mxu0 %v3363_v12  ;;  %v3410_v12 = vld [vmem:[#allocation2 + $0x2d8] sm:$0xff]  }
  0x3f   :  { %3057 = vmatprep.subr.bf16.mxu0 %v3365_v14  ;;  %3078 = vmatpush3.bf16.msra.mxu1 %v3364_v13  ;;  %v3411_v13 = vld [vmem:[#allocation2 + $0x218] sm:$0xff]  }
  0x40   :  { %3079 = vmatprep.subr.bf16.mxu1 %v3366_v15  ;;  %v3412_v14 = vld [vmem:[#allocation2 + $0x298] sm:$0xff]   ;;  %v3413_v15 = vld [vmem:[#allocation2 + $0x260] sm:$0xff]  }
  0x42   :  { %3058 = vmatpush3.bf16.msra.mxu0 %v3367_v16  ;;  %v3414_v16 = vld [vmem:[#allocation2 + $0x2e0] sm:$0xff]  }
  0x43   :  { %3059 = vmatprep.subr.bf16.mxu0 %v3369_v18  ;;  %3080 = vmatpush3.bf16.msra.mxu1 %v3368_v17  ;;  %v3415_v17 = vld [vmem:[#allocation2 + $0x220] sm:$0xff]  }
  0x44   :  { %3081 = vmatprep.subr.bf16.mxu1 %v3370_v19  ;;  %v3416_v18 = vld [vmem:[#allocation2 + $0x2a0] sm:$0xff]   ;;  %v3417_v19 = vld [vmem:[#allocation2 + $0x268] sm:$0xff]  }
  0x46   :  { %3060 = vmatpush3.bf16.msra.mxu0 %v3371_v20  ;;  %v3418_v20 = vld [vmem:[#allocation2 + $0x2e8] sm:$0xff]  }
  0x47   :  { %3061 = vmatprep.subr.bf16.mxu0 %v3373_v22  ;;  %3082 = vmatpush3.bf16.msra.mxu1 %v3372_v21  ;;  %v3419_v21 = vld [vmem:[#allocation2 + $0x228] sm:$0xff]  }
  0x48   :  { %3083 = vmatprep.subr.bf16.mxu1 %v3374_v23  ;;  %v3420_v22 = vld [vmem:[#allocation2 + $0x2a8] sm:$0xff]   ;;  %v3421_v23 = vld [vmem:[#allocation2 + $0x270] sm:$0xff]  }
  0x4a   :  { %3062 = vmatpush3.bf16.msra.mxu0 %v3375_v24  ;;  %v3422_v24 = vld [vmem:[#allocation2 + $0x2f0] sm:$0xff]  }
  0x4b   :  { %3063 = vmatprep.subr.bf16.mxu0 %v3377_v26  ;;  %3084 = vmatpush3.bf16.msra.mxu1 %v3376_v25  ;;  %v3423_v25 = vld [vmem:[#allocation2 + $0x230] sm:$0xff]  }
  0x4c   :  { %3085 = vmatprep.subr.bf16.mxu1 %v3378_v27  ;;  %v3424_v26 = vld [vmem:[#allocation2 + $0x2b0] sm:$0xff]   ;;  %v3425_v27 = vld [vmem:[#allocation2 + $0x278] sm:$0xff]  }
  0x4e   :  { %3064 = vmatpush3.bf16.msra.mxu0 %v3379_v28  ;;  %v3426_v28 = vld [vmem:[#allocation2 + $0x2f8] sm:$0xff]  }
  0x4f   :  { %3065 = vmatprep.subr.bf16.mxu0 %v3381_v30  ;;  %3086 = vmatpush3.bf16.msra.mxu1 %v3380_v29  ;;  %v3427_v29 = vld [vmem:[#allocation2 + $0x238] sm:$0xff]  }
  0x50   :  { %3087 = vmatprep.subr.bf16.mxu1 %v3382_v31  ;;  %v3428_v30 = vld [vmem:[#allocation2 + $0x2b8] sm:$0xff]   ;;  %v3429_v31 = vld [vmem:[%s3916_s0 + $0x10] ss:$48 sps:$4 sm:$0xff]  }
  0x51   :  { %v214_v36 = vrot.slane %v3429_v31, %v3680_v37  ;;  %v3479_v31 = vld [vmem:[%s3916_s0 + $0x138] ss:$48 sps:$4 sm:$0xff]  }
  0x52   :  { %3066 = vmatpush3.bf16.msra.mxu0 %v3383_v32  ;;  %v3431_v32 = vld [vmem:[%s3916_s0 + $0x70] ss:$48 sps:$4 sm:$0xff]   ;;  %v480_v39 = vrot.slane %v3479_v31, %v3680_v37 }
  0x53   :  { %3088 = vmatpush3.bf16.msra.mxu1 %v3384_v33  ;;  %3095 = vmatprep.subr.bf16.mxu0 %v3397_v49  ;;  %v3433_v33 = vld [vmem:[%s3916_s0 + $0xd0] ss:$48 sps:$4 sm:$0xff]   ;;  %v228_v38 = vrot.slane %v3431_v32, %v3680_v37  ;;  %v451_v49 = vrot.slane %v3440_v41, %v3680_v37 }
  0x54   :  { %3117 = vmatprep.subr.bf16.mxu1 %v3398_v54  ;;  %v430_v42 = vrot.slane %v3433_v33, %v3680_v37  ;;  %v3443_v54 = vld [vmem:[#allocation2 + $0x300] sm:$0xff]   ;;  %v3481_v33 = vld [vmem:[%s3916_s0 + $0x1c] ss:$48 sps:$4 sm:$0xff]  }
  0x55   :  { %2294 = vmatmul.mubr.bf16.vlgmr.msra.gmra.mrb[4].mxu0 %v616_v0  ;;  %v237_v46 = vcombine.high %v214_v36, %v228_v38  ;;  %v236_v52 = vcombine.low %v214_v36, %v228_v38  ;;  %v455_v56 = vcombine.high %v437_v48, %v451_v49  ;;  %v454_v58 = vcombine.low %v437_v48, %v451_v49  ;;  %v3486_v49 = vld [vmem:[#allocation2 + $0x4c0] sm:$0xff]  }
  0x56   :  { %2335 = vmatmul.mubr.bf16.vlgmr.msra.gmra.mrb[4].mxu1 %v618_v3  ;;  %3096 = vmatpush3.bf16.msra.mxu0 %v3399_v59  ;;  %v453_v51 = vcombine.high %v430_v42, %v444_v43  ;;  %v452_v53 = vcombine.low %v430_v42, %v444_v43  ;;  %v3444_v59 = vld [vmem:[#allocation2 + $0x380] sm:$0xff]   ;;  %v3448_v3 = vld [vmem:[#allocation2 + $0x388] sm:$0xff]   ;;  %v257_v41 = vrot.slane %v3481_v33, %v3680_v37 }
  0x57   :  { %3118 = vmatpush3.bf16.msra.mxu1 %v3400_v62  ;;  %3097 = vmatprep.subr.bf16.mxu0 %v3401_v1  ;;  %v3445_v62 = vld [vmem:[#allocation2 + $0x348] sm:$0xff]   ;;  %v623_v63 = vpack.c.bf16 %v455_v56, %v239_v55  ;;  %v622_v0 = vpack.c.bf16 %v454_v58, %v238_v57  ;;  %v271_v42 = vrot.slane %v3482_v34, %v3680_v37  ;;  %v3488_v57 = vld [vmem:[#allocation2 + $0x480] sm:$0xff]  }
  0x58   :  { %3119 = vmatprep.subr.bf16.mxu1 %v3402_v4  ;;  %v621_v60 = vpack.c.bf16 %v453_v51, %v237_v46  ;;  %v620_v61 = vpack.c.bf16 %v452_v53, %v236_v52  ;;  %v3446_v1 = vld [vmem:[#allocation2 + $0x3c8] sm:$0xff]   ;;  %v3449_v4 = vld [vmem:[#allocation2 + $0x350] sm:$0xff]   ;;  %v473_v43 = vrot.slane %v3483_v35, %v3680_v37  ;;  %v3487_v53 = vld [vmem:[#allocation2 + $0x400] sm:$0xff]  }
  0x59   :  { %2416 = vmatprep.mubr.bf16.mxu1 %v623_v63  ;;  %v274_v52 = vcombine.low %v257_v41, %v271_v42  ;;  %v3491_v63 = vld [vmem:[#allocation2 + $0x408] sm:$0xff]   ;;  %v3527_v34 = vld [vmem:[%s3916_s0 + $0xe4] ss:$48 sps:$4 sm:$0xff]  }
  0x5a   :  { %3098 = vmatpush3.bf16.msra.mxu0 %v3403_v5  ;;  %2375 = vmatprep.mubr.bf16.mxu0 %v621_v60  ;;  %v3450_v5 = vld [vmem:[#allocation2 + $0x3d0] sm:$0xff]   ;;  %v491_v55 = vcombine.high %v473_v43, %v487_v47  ;;  %v490_v56 = vcombine.low %v473_v43, %v487_v47 }
  0x5b   :  { %3120 = vmatpush3.bf16.msra.mxu1 %v3404_v6  ;;  %3099 = vmatprep.subr.bf16.mxu0 %v3405_v7  ;;  %v3451_v6 = vld [vmem:[#allocation2 + $0x310] sm:$0xff]  }
  0x5c   :  { %3121 = vmatprep.subr.bf16.mxu1 %v3406_v8  ;;  %v3452_v7 = vld [vmem:[#allocation2 + $0x390] sm:$0xff]   ;;  %v3453_v8 = vld [vmem:[#allocation2 + $0x358] sm:$0xff]  }
  0x5d   :  { %v3528_v35 = vld [vmem:[%s3916_s0 + $0x144] ss:$48 sps:$4 sm:$0xff]  }
  0x5e   :  { %3100 = vmatpush3.bf16.msra.mxu0 %v3407_v9  ;;  %v3454_v9 = vld [vmem:[#allocation2 + $0x3d8] sm:$0xff]   ;;  %v523_v43 = vrot.slane %v3528_v35, %v3680_v37 }
  0x5f   :  { %3122 = vmatpush3.bf16.msra.mxu1 %v3408_v10  ;;  %3101 = vmatprep.subr.bf16.mxu0 %v3409_v11  ;;  %v3455_v10 = vld [vmem:[#allocation2 + $0x318] sm:$0xff]  }
  0x60   :  { %3123 = vmatprep.subr.bf16.mxu1 %v3410_v12  ;;  %v3456_v11 = vld [vmem:[#allocation2 + $0x398] sm:$0xff]   ;;  %v3457_v12 = vld [vmem:[#allocation2 + $0x360] sm:$0xff]  }
  0x62   :  { %3102 = vmatpush3.bf16.msra.mxu0 %v3411_v13  ;;  %v3458_v13 = vld [vmem:[#allocation2 + $0x3e0] sm:$0xff]  }
  0x63   :  { %3124 = vmatpush3.bf16.msra.mxu1 %v3412_v14  ;;  %3103 = vmatprep.subr.bf16.mxu0 %v3413_v15  ;;  %v3459_v14 = vld [vmem:[#allocation2 + $0x320] sm:$0xff]  }
  0x64   :  { %3125 = vmatprep.subr.bf16.mxu1 %v3414_v16  ;;  %v3460_v15 = vld [vmem:[#allocation2 + $0x3a0] sm:$0xff]   ;;  %v3461_v16 = vld [vmem:[#allocation2 + $0x368] sm:$0xff]  }
  0x66   :  { %3104 = vmatpush3.bf16.msra.mxu0 %v3415_v17  ;;  %v3462_v17 = vld [vmem:[#allocation2 + $0x3e8] sm:$0xff]  }
  0x67   :  { %3126 = vmatpush3.bf16.msra.mxu1 %v3416_v18  ;;  %3105 = vmatprep.subr.bf16.mxu0 %v3417_v19  ;;  %v3463_v18 = vld [vmem:[#allocation2 + $0x328] sm:$0xff]  }
  0x68   :  { %3127 = vmatprep.subr.bf16.mxu1 %v3418_v20  ;;  %v3464_v19 = vld [vmem:[#allocation2 + $0x3a8] sm:$0xff]   ;;  %v3465_v20 = vld [vmem:[#allocation2 + $0x370] sm:$0xff]  }
  0x6a   :  { %3106 = vmatpush3.bf16.msra.mxu0 %v3419_v21  ;;  %v3466_v21 = vld [vmem:[#allocation2 + $0x3f0] sm:$0xff]  }
  0x6b   :  { %3128 = vmatpush3.bf16.msra.mxu1 %v3420_v22  ;;  %3107 = vmatprep.subr.bf16.mxu0 %v3421_v23  ;;  %v3467_v22 = vld [vmem:[#allocation2 + $0x330] sm:$0xff]  }
  0x6c   :  { %3129 = vmatprep.subr.bf16.mxu1 %v3422_v24  ;;  %v3468_v23 = vld [vmem:[#allocation2 + $0x3b0] sm:$0xff]   ;;  %v3469_v24 = vld [vmem:[#allocation2 + $0x378] sm:$0xff]  }
  0x6e   :  { %3108 = vmatpush3.bf16.msra.mxu0 %v3423_v25  ;;  %v3470_v25 = vld [vmem:[#allocation2 + $0x3f8] sm:$0xff]  }
  0x6f   :  { %3130 = vmatpush3.bf16.msra.mxu1 %v3424_v26  ;;  %3109 = vmatprep.subr.bf16.mxu0 %v3425_v27  ;;  %v3471_v26 = vld [vmem:[#allocation2 + $0x338] sm:$0xff]  }
  0x70   :  { %3131 = vmatprep.subr.bf16.mxu1 %v3426_v28  ;;  %v3472_v27 = vld [vmem:[#allocation2 + $0x3b8] sm:$0xff]  }
  0x71   :  { %v3473_v28 = vld [vmem:[%s3916_s0 + $0x18] ss:$48 sps:$4 sm:$0xff]  }
  0x72   :  { %3110 = vmatpush3.bf16.msra.mxu0 %v3427_v29  ;;  %v3475_v29 = vld [vmem:[%s3916_s0 + $0x78] ss:$48 sps:$4 sm:$0xff]   ;;  %v250_v32 = vrot.slane %v3473_v28, %v3680_v37  ;;  %v3523_v28 = vld [vmem:[%s3916_s0 + $0x140] ss:$48 sps:$4 sm:$0xff]  }
  0x73   :  { %3132 = vmatpush3.bf16.msra.mxu1 %v3428_v30  ;;  %3139 = vmatprep.subr.bf16.mxu0 %v3441_v45  ;;  %v3477_v30 = vld [vmem:[%s3916_s0 + $0xd8] ss:$48 sps:$4 sm:$0xff]   ;;  %v264_v36 = vrot.slane %v3475_v29, %v3680_v37  ;;  %v3525_v29 = vld [vmem:[%s3916_s0 + $0x24] ss:$48 sps:$4 sm:$0xff]  }
  0x74   :  { %3161 = vmatprep.subr.bf16.mxu1 %v3442_v50  ;;  %v466_v38 = vrot.slane %v3477_v30, %v3680_v37  ;;  %v275_v50 = vcombine.high %v257_v41, %v271_v42  ;;  %v3526_v30 = vld [vmem:[%s3916_s0 + $0x84] ss:$48 sps:$4 sm:$0xff]   ;;  %v509_v42 = vrot.slane %v3527_v34, %v3680_v37 }
  0x75   :  { %2376 = vmatmul.mubr.bf16.vlgmr.msra.gmra.mrb[8].mxu0 %v620_v61  ;;  %v273_v45 = vcombine.high %v250_v32, %v264_v36  ;;  %v272_v48 = vcombine.low %v250_v32, %v264_v36  ;;  %v626_v61 = vpack.c.bf16 %v490_v56, %v274_v52  ;;  %v516_v36 = vrot.slane %v3523_v28, %v3680_v37  ;;  %v3533_v56 = vld [vmem:[#allocation2 + $0x548] sm:$0xff]  }
  0x76   :  { %2417 = vmatmul.mubr.bf16.vlgmr.msra.gmra.mrb[8].mxu1 %v622_v0  ;;  %3140 = vmatpush3.bf16.msra.mxu0 %v3443_v54  ;;  %v489_v46 = vcombine.high %v466_v38, %v480_v39  ;;  %v488_v51 = vcombine.low %v466_v38, %v480_v39  ;;  %v627_v60 = vpack.c.bf16 %v491_v55, %v275_v50  ;;  %v3492_v0 = vld [vmem:[#allocation2 + $0x488] sm:$0xff]   ;;  %v3531_v50 = vld [vmem:[#allocation2 + $0x500] sm:$0xff]  }
  0x77   :  { %3162 = vmatpush3.bf16.msra.mxu1 %v3444_v59  ;;  %3141 = vmatprep.subr.bf16.mxu0 %v3445_v62  ;;  %v3489_v59 = vld [vmem:[#allocation2 + $0x448] sm:$0xff]   ;;  %v293_v38 = vrot.slane %v3525_v29, %v3680_v37  ;;  %v307_v39 = vrot.slane %v3526_v30, %v3680_v37  ;;  %v526_v52 = vcombine.low %v509_v42, %v523_v43 }
  0x78   :  { %3163 = vmatprep.subr.bf16.mxu1 %v3446_v1  ;;  %v625_v54 = vpack.c.bf16 %v489_v46, %v273_v45  ;;  %v624_v58 = vpack.c.bf16 %v488_v51, %v272_v48  ;;  %v3490_v62 = vld [vmem:[#allocation2 + $0x4c8] sm:$0xff]   ;;  %2498 = vmatprep.mubr.bf16.mxu1 %v627_v60  ;;  %v3493_v1 = vld [vmem:[#allocation2 + $0x450] sm:$0xff]   ;;  %v3530_v45 = vld [vmem:[#allocation2 + $0x5c0] sm:$0xff]   ;;  %v527_v51 = vcombine.high %v509_v42, %v523_v43 }
  0x79   :  { %v311_v47 = vcombine.high %v293_v38, %v307_v39  ;;  %v3535_v60 = vld [vmem:[#allocation2 + $0x508] sm:$0xff]  }
  0x7a   :  { %3142 = vmatpush3.bf16.msra.mxu0 %v3447_v2  ;;  %2457 = vmatprep.mubr.bf16.mxu0 %v625_v54  ;;  %v3494_v2 = vld [vmem:[#allocation2 + $0x4d0] sm:$0xff]   ;;  %v3570_v29 = vld [vmem:[%s3916_s0 + $0x8c] ss:$48 sps:$4 sm:$0xff]  }
  0x7b   :  { %3164 = vmatpush3.bf16.msra.mxu1 %v3448_v3  ;;  %3143 = vmatprep.subr.bf16.mxu0 %v3449_v4  ;;  %v3495_v3 = vld [vmem:[#allocation2 + $0x410] sm:$0xff]   ;;  %v3571_v30 = vld [vmem:[%s3916_s0 + $0xec] ss:$48 sps:$4 sm:$0xff]  }
  0x7c   :  { %3165 = vmatprep.subr.bf16.mxu1 %v3450_v5  ;;  %v3496_v4 = vld [vmem:[#allocation2 + $0x490] sm:$0xff]   ;;  %v3497_v5 = vld [vmem:[#allocation2 + $0x458] sm:$0xff]  }
  0x7e   :  { %3144 = vmatpush3.bf16.msra.mxu0 %v3451_v6  ;;  %v3498_v6 = vld [vmem:[#allocation2 + $0x4d8] sm:$0xff]  }
  0x7f   :  { %3166 = vmatpush3.bf16.msra.mxu1 %v3452_v7  ;;  %3145 = vmatprep.subr.bf16.mxu0 %v3453_v8  ;;  %v3499_v7 = vld [vmem:[#allocation2 + $0x418] sm:$0xff]  }
  0x80   :  { %3167 = vmatprep.subr.bf16.mxu1 %v3454_v9  ;;  %v3500_v8 = vld [vmem:[#allocation2 + $0x498] sm:$0xff]   ;;  %v3501_v9 = vld [vmem:[#allocation2 + $0x460] sm:$0xff]  }
  0x82   :  { %3146 = vmatpush3.bf16.msra.mxu0 %v3455_v10  ;;  %v3502_v10 = vld [vmem:[#allocation2 + $0x4e0] sm:$0xff]  }
  0x83   :  { %3168 = vmatpush3.bf16.msra.mxu1 %v3456_v11  ;;  %3147 = vmatprep.subr.bf16.mxu0 %v3457_v12  ;;  %v3503_v11 = vld [vmem:[#allocation2 + $0x420] sm:$0xff]  }
  0x84   :  { %3169 = vmatprep.subr.bf16.mxu1 %v3458_v13  ;;  %v3504_v12 = vld [vmem:[#allocation2 + $0x4a0] sm:$0xff]   ;;  %v3505_v13 = vld [vmem:[#allocation2 + $0x468] sm:$0xff]  }
  0x86   :  { %3148 = vmatpush3.bf16.msra.mxu0 %v3459_v14  ;;  %v3506_v14 = vld [vmem:[#allocation2 + $0x4e8] sm:$0xff]  }
  0x87   :  { %3170 = vmatpush3.bf16.msra.mxu1 %v3460_v15  ;;  %3149 = vmatprep.subr.bf16.mxu0 %v3461_v16  ;;  %v3507_v15 = vld [vmem:[#allocation2 + $0x428] sm:$0xff]  }
  0x88   :  { %3171 = vmatprep.subr.bf16.mxu1 %v3462_v17  ;;  %v3508_v16 = vld [vmem:[#allocation2 + $0x4a8] sm:$0xff]   ;;  %v3509_v17 = vld [vmem:[#allocation2 + $0x470] sm:$0xff]  }
  0x8a   :  { %3150 = vmatpush3.bf16.msra.mxu0 %v3463_v18  ;;  %v3510_v18 = vld [vmem:[#allocation2 + $0x4f0] sm:$0xff]  }
  0x8b   :  { %3172 = vmatpush3.bf16.msra.mxu1 %v3464_v19  ;;  %3151 = vmatprep.subr.bf16.mxu0 %v3465_v20  ;;  %v3511_v19 = vld [vmem:[#allocation2 + $0x430] sm:$0xff]  }
  0x8c   :  { %3173 = vmatprep.subr.bf16.mxu1 %v3466_v21  ;;  %v3512_v20 = vld [vmem:[#allocation2 + $0x4b0] sm:$0xff]   ;;  %v3513_v21 = vld [vmem:[#allocation2 + $0x478] sm:$0xff]  }
  0x8e   :  { %3152 = vmatpush3.bf16.msra.mxu0 %v3467_v22  ;;  %v3514_v22 = vld [vmem:[#allocation2 + $0x4f8] sm:$0xff]  }
  0x8f   :  { %3174 = vmatpush3.bf16.msra.mxu1 %v3468_v23  ;;  %3153 = vmatprep.subr.bf16.mxu0 %v3469_v24  ;;  %v3515_v23 = vld [vmem:[#allocation2 + $0x438] sm:$0xff]  }
  0x90   :  { %3175 = vmatprep.subr.bf16.mxu1 %v3470_v25  ;;  %v3516_v24 = vld [vmem:[#allocation2 + $0x4b8] sm:$0xff]   ;;  %v3517_v25 = vld [vmem:[%s3916_s0 + $0x20] ss:$48 sps:$4 sm:$0xff]  }
  0x91   :  { %v286_v31 = vrot.slane %v3517_v25, %v3680_v37  ;;  %v3567_v25 = vld [vmem:[%s3916_s0 + $0x148] ss:$48 sps:$4 sm:$0xff]  }
  0x92   :  { %3154 = vmatpush3.bf16.msra.mxu0 %v3471_v26  ;;  %v3519_v26 = vld [vmem:[%s3916_s0 + $0x80] ss:$48 sps:$4 sm:$0xff]  }
  0x93   :  { %3176 = vmatpush3.bf16.msra.mxu1 %v3472_v27  ;;  %3183 = vmatprep.subr.bf16.mxu0 %v3485_v44  ;;  %v3521_v27 = vld [vmem:[%s3916_s0 + $0xe0] ss:$48 sps:$4 sm:$0xff]   ;;  %v300_v32 = vrot.slane %v3519_v26, %v3680_v37  ;;  %v3569_v26 = vld [vmem:[%s3916_s0 + $0x2c] ss:$48 sps:$4 sm:$0xff]  }
  0x94   :  { %3205 = vmatprep.subr.bf16.mxu1 %v3486_v49  ;;  %v502_v33 = vrot.slane %v3521_v27, %v3680_v37  ;;  %v310_v49 = vcombine.low %v293_v38, %v307_v39  ;;  %v329_v34 = vrot.slane %v3569_v26, %v3680_v37  ;;  %v545_v38 = vrot.slane %v3571_v30, %v3680_v37  ;;  %v3579_v26 = vld [vmem:[%s3919_s3 + $0x30] sm:$0xff]  }
  0x95   :  { %2458 = vmatmul.mubr.bf16.vlgmr.msra.gmra.mrb[12].mxu0 %v624_v58  ;;  %v309_v41 = vcombine.high %v286_v31, %v300_v32  ;;  %v308_v44 = vcombine.low %v286_v31, %v300_v32  ;;  %v3572_v31 = vld [vmem:[%s3916_s0 + $0x14c] ss:$48 sps:$4 sm:$0xff]  }
  0x96   :  { %3184 = vmatpush3.bf16.msra.mxu0 %v3487_v53  ;;  %2499 = vmatmul.mubr.bf16.vlgmr.msra.gmra.mrb[12].mxu1 %v626_v61  ;;  %v525_v46 = vcombine.high %v502_v33, %v516_v36  ;;  %v524_v48 = vcombine.low %v502_v33, %v516_v36  ;;  %v3532_v53 = vld [vmem:[#allocation2 + $0x580] sm:$0xff]   ;;  %v630_v58 = vpack.c.bf16 %v526_v52, %v310_v49  ;;  %v3536_v61 = vld [vmem:[#allocation2 + $0x588] sm:$0xff]  }
  0x97   :  { %3185 = vmatprep.subr.bf16.mxu0 %v3489_v59  ;;  %3206 = vmatpush3.bf16.msra.mxu1 %v3488_v57  ;;  %v631_v57 = vpack.c.bf16 %v527_v51, %v311_v47  ;;  %v3534_v59 = vld [vmem:[#allocation2 + $0x5c8] sm:$0xff]   ;;  %v552_v33 = vrot.slane %v3567_v25, %v3680_v37  ;;  %v343_v36 = vrot.slane %v3570_v29, %v3680_v37 }
  0x98   :  { %3207 = vmatprep.subr.bf16.mxu1 %v3490_v62  ;;  %v629_v54 = vpack.c.bf16 %v525_v46, %v309_v41  ;;  %v628_v55 = vpack.c.bf16 %v524_v48, %v308_v44  ;;  %v3537_v62 = vld [vmem:[#allocation2 + $0x550] sm:$0xff]   ;;  %v559_v39 = vrot.slane %v3572_v31, %v3680_v37  ;;  %v3578_v25 = vld [vmem:[%s3919_s3 + $0x28] sm:$0xff]  }
  0x99   :  { %2580 = vmatprep.mubr.bf16.mxu1 %v631_v57  ;;  %v347_v43 = vcombine.high %v329_v34, %v343_v36 }
  0x9a   :  { %3186 = vmatpush3.bf16.msra.mxu0 %v3491_v63  ;;  %2539 = vmatprep.mubr.bf16.mxu0 %v629_v54  ;;  %v3538_v63 = vld [vmem:[#allocation2 + $0x5d0] sm:$0xff]   ;;  %v563_v44 = vcombine.high %v545_v38, %v559_v39  ;;  %v562_v46 = vcombine.low %v545_v38, %v559_v39 }
  0x9b   :  { %3187 = vmatprep.subr.bf16.mxu0 %v3493_v1  ;;  %3208 = vmatpush3.bf16.msra.mxu1 %v3492_v0  ;;  %v3539_v0 = vld [vmem:[#allocation2 + $0x510] sm:$0xff]  }
  0x9c   :  { %3209 = vmatprep.subr.bf16.mxu1 %v3494_v2  ;;  %v3540_v1 = vld [vmem:[#allocation2 + $0x590] sm:$0xff]   ;;  %v3541_v2 = vld [vmem:[#allocation2 + $0x558] sm:$0xff]   ;;  %v635_v49 = vpack.c.bf16 %v563_v44, %v347_v43 }
  0x9e   :  { %3188 = vmatpush3.bf16.msra.mxu0 %v3495_v3  ;;  %v3542_v3 = vld [vmem:[#allocation2 + $0x5d8] sm:$0xff]  }
  0x9f   :  { %3189 = vmatprep.subr.bf16.mxu0 %v3497_v5  ;;  %3210 = vmatpush3.bf16.msra.mxu1 %v3496_v4  ;;  %v3543_v4 = vld [vmem:[#allocation2 + $0x518] sm:$0xff]  }
  0xa0   :  { %3211 = vmatprep.subr.bf16.mxu1 %v3498_v6  ;;  %v3544_v5 = vld [vmem:[#allocation2 + $0x598] sm:$0xff]   ;;  %v3545_v6 = vld [vmem:[#allocation2 + $0x560] sm:$0xff]  }
  0xa2   :  { %3190 = vmatpush3.bf16.msra.mxu0 %v3499_v7  ;;  %v3546_v7 = vld [vmem:[#allocation2 + $0x5e0] sm:$0xff]  }
  0xa3   :  { %3191 = vmatprep.subr.bf16.mxu0 %v3501_v9  ;;  %3212 = vmatpush3.bf16.msra.mxu1 %v3500_v8  ;;  %v3547_v8 = vld [vmem:[#allocation2 + $0x520] sm:$0xff]  }
  0xa4   :  { %3213 = vmatprep.subr.bf16.mxu1 %v3502_v10  ;;  %v3548_v9 = vld [vmem:[#allocation2 + $0x5a0] sm:$0xff]   ;;  %v3549_v10 = vld [vmem:[#allocation2 + $0x568] sm:$0xff]  }
  0xa6   :  { %3192 = vmatpush3.bf16.msra.mxu0 %v3503_v11  ;;  %v3550_v11 = vld [vmem:[#allocation2 + $0x5e8] sm:$0xff]  }
  0xa7   :  { %3193 = vmatprep.subr.bf16.mxu0 %v3505_v13  ;;  %3214 = vmatpush3.bf16.msra.mxu1 %v3504_v12  ;;  %v3551_v12 = vld [vmem:[#allocation2 + $0x528] sm:$0xff]  }
  0xa8   :  { %3215 = vmatprep.subr.bf16.mxu1 %v3506_v14  ;;  %v3552_v13 = vld [vmem:[#allocation2 + $0x5a8] sm:$0xff]   ;;  %v3553_v14 = vld [vmem:[#allocation2 + $0x570] sm:$0xff]  }
  0xaa   :  { %3194 = vmatpush3.bf16.msra.mxu0 %v3507_v15  ;;  %v3554_v15 = vld [vmem:[#allocation2 + $0x5f0] sm:$0xff]  }
  0xab   :  { %3195 = vmatprep.subr.bf16.mxu0 %v3509_v17  ;;  %3216 = vmatpush3.bf16.msra.mxu1 %v3508_v16  ;;  %v3555_v16 = vld [vmem:[#allocation2 + $0x530] sm:$0xff]  }
  0xac   :  { %3217 = vmatprep.subr.bf16.mxu1 %v3510_v18  ;;  %v3556_v17 = vld [vmem:[#allocation2 + $0x5b0] sm:$0xff]   ;;  %v3557_v18 = vld [vmem:[#allocation2 + $0x578] sm:$0xff]  }
  0xae   :  { %3196 = vmatpush3.bf16.msra.mxu0 %v3511_v19  ;;  %v3558_v19 = vld [vmem:[#allocation2 + $0x5f8] sm:$0xff]  }
  0xaf   :  { %3197 = vmatprep.subr.bf16.mxu0 %v3513_v21  ;;  %3218 = vmatpush3.bf16.msra.mxu1 %v3512_v20  ;;  %v3559_v20 = vld [vmem:[#allocation2 + $0x538] sm:$0xff]  }
  0xb0   :  { %3219 = vmatprep.subr.bf16.mxu1 %v3514_v22  ;;  %v3560_v21 = vld [vmem:[#allocation2 + $0x5b8] sm:$0xff]  }
  0xb1   :  { %v3561_v22 = vld [vmem:[%s3916_s0 + $0x28] ss:$48 sps:$4 sm:$0xff]  }
  0xb2   :  { %3198 = vmatpush3.bf16.msra.mxu0 %v3515_v23  ;;  %v3563_v23 = vld [vmem:[%s3916_s0 + $0x88] ss:$48 sps:$4 sm:$0xff]   ;;  %v322_v27 = vrot.slane %v3561_v22, %v3680_v37 }
  0xb3   :  { %3220 = vmatpush3.bf16.msra.mxu1 %v3516_v24  ;;  %3227 = vmatprep.subr.bf16.mxu0 %v3529_v40  ;;  %v3565_v24 = vld [vmem:[%s3916_s0 + $0xe8] ss:$48 sps:$4 sm:$0xff]   ;;  %v336_v28 = vrot.slane %v3563_v23, %v3680_v37  ;;  %v3577_v23 = vld [vmem:[%s3919_s3 + $0x20] sm:$0xff]  }
  0xb4   :  { %3249 = vmatprep.subr.bf16.mxu1 %v3530_v45  ;;  %v538_v32 = vrot.slane %v3565_v24, %v3680_v37  ;;  %v346_v45 = vcombine.low %v329_v34, %v343_v36  ;;  %v2805_v37 = vld [vmem:[%s3918_s2] ss:$0 sm:$0xff] }
  0xb5   :  { %2540 = vmatmul.mubr.bf16.vlgmr.msra.gmra.mrb[16].mxu0 %v628_v55  ;;  %v345_v35 = vcombine.high %v322_v27, %v336_v28  ;;  %v344_v41 = vcombine.low %v322_v27, %v336_v28  ;;  %v3580_v27 = vld [vmem:[%s3919_s3 + $0x38] sm:$0xff]  }
  0xb6   :  { %2581 = vmatmul.mubr.bf16.vlgmr.msra.gmra.mrb[16].mxu1 %v630_v58  ;;  %3228 = vmatpush3.bf16.msra.mxu0 %v3531_v50  ;;  %v561_v40 = vcombine.high %v538_v32, %v552_v33  ;;  %v560_v42 = vcombine.low %v538_v32, %v552_v33  ;;  %v634_v50 = vpack.c.bf16 %v562_v46, %v346_v45 }
  0xb7   :  { %3250 = vmatpush3.bf16.msra.mxu1 %v3532_v53  ;;  %3229 = vmatprep.subr.bf16.mxu0 %v3533_v56 }
  0xb8   :  { %3251 = vmatprep.subr.bf16.mxu1 %v3534_v59  ;;  %v633_v47 = vpack.c.bf16 %v561_v40, %v345_v35  ;;  %v632_v48 = vpack.c.bf16 %v560_v42, %v344_v41  ;;  %2662 = vmatprep.mubr.bf16.mxu1 %v635_v49 }
  0xba   :  { %3230 = vmatpush3.bf16.msra.mxu0 %v3535_v60  ;;  %2621 = vmatprep.mubr.bf16.mxu0 %v633_v47 }
  0xbb   :  { %3252 = vmatpush3.bf16.msra.mxu1 %v3536_v61  ;;  %3231 = vmatprep.subr.bf16.mxu0 %v3537_v62 }
  0xbc   :  { %3253 = vmatprep.subr.bf16.mxu1 %v3538_v63 }
  0xbe   :  { %3232 = vmatpush3.bf16.msra.mxu0 %v3539_v0 }
  0xbf   :  { %3254 = vmatpush3.bf16.msra.mxu1 %v3540_v1  ;;  %3233 = vmatprep.subr.bf16.mxu0 %v3541_v2 }
  0xc0   :  { %3255 = vmatprep.subr.bf16.mxu1 %v3542_v3  ;;  %v3573_v3 = vld [vmem:[%s3919_s3] sm:$0xff]  }
  0xc2   :  { %3234 = vmatpush3.bf16.msra.mxu0 %v3543_v4  ;;  %v3633_v4 = vmov 0.0  }
  0xc3   :  { %3256 = vmatpush3.bf16.msra.mxu1 %v3544_v5  ;;  %3235 = vmatprep.subr.bf16.mxu0 %v3545_v6  ;;  %v3574_v5 = vld [vmem:[%s3919_s3 + $0x8] sm:$0xff]   ;;  %v3575_v6 = vld [vmem:[%s3919_s3 + $0x10] sm:$0xff]  }
  0xc4   :  { %3257 = vmatprep.subr.bf16.mxu1 %v3546_v7 }
  0xc6   :  { %3236 = vmatpush3.bf16.msra.mxu0 %v3547_v8 }
  0xc7   :  { %3258 = vmatpush3.bf16.msra.mxu1 %v3548_v9  ;;  %3237 = vmatprep.subr.bf16.mxu0 %v3549_v10 }
  0xc8   :  { %3259 = vmatprep.subr.bf16.mxu1 %v3550_v11 }
  0xca   :  { %3238 = vmatpush3.bf16.msra.mxu0 %v3551_v12 }
  0xcb   :  { %3260 = vmatpush3.bf16.msra.mxu1 %v3552_v13  ;;  %3239 = vmatprep.subr.bf16.mxu0 %v3553_v14  ;;  %v3576_v13 = vld [vmem:[%s3919_s3 + $0x18] sm:$0xff]  }
  0xcc   :  { %3261 = vmatprep.subr.bf16.mxu1 %v3554_v15 }
  0xce   :  { %3240 = vmatpush3.bf16.msra.mxu0 %v3555_v16 }
  0xcf   :  { %3262 = vmatpush3.bf16.msra.mxu1 %v3556_v17  ;;  %3241 = vmatprep.subr.bf16.mxu0 %v3557_v18 }
  0xd0   :  { %3263 = vmatprep.subr.bf16.mxu1 %v3558_v19 }
  0xd2   :  { %3242 = vmatpush3.bf16.msra.mxu0 %v3559_v20 }
  0xd3   :  { %3264 = vmatpush3.bf16.msra.mxu1 %v3560_v21  ;;  %3280 = vmatprep.subr.bf16.mxu0 %v3633_v4 }
  0xd5   :  { %2622 = vmatmul.mubr.bf16.vlgmr.msra.gmra.mrb[20].mxu0 %v632_v48 }
  0xd6   :  { %2663 = vmatmul.mubr.bf16.vlgmr.msra.gmra.mrb[20].mxu1 %v634_v50  ;;  %3281 = vmatpush3.bf16.msra.mxu0 %v3573_v3 }
  0xd7   :  { %3282 = vmatprep.subr.bf16.mxu0 %v3633_v4  ;;  %3296 = vmatprep.mubr.msk.bf16.mxu0 %vm3634_vm0, %v3633_v4 }
  0xda   :  { %3283 = vmatpush3.bf16.msra.mxu0 %v3574_v5 }
  0xdb   :  { %3284 = vmatprep.subr.bf16.mxu0 %v3633_v4 }
  0xde   :  { %3285 = vmatpush3.bf16.msra.mxu0 %v3575_v6 }
  0xdf   :  { %3286 = vmatprep.subr.bf16.mxu0 %v3633_v4 }
  0xe2   :  { %3287 = vmatpush3.bf16.msra.mxu0 %v3576_v13 }
  0xe3   :  { %3288 = vmatprep.subr.bf16.mxu0 %v3633_v4 }
  0xe6   :  { %3289 = vmatpush3.bf16.msra.mxu0 %v3577_v23 }
  0xe7   :  { %3290 = vmatprep.subr.bf16.mxu0 %v3633_v4 }
  0xea   :  { %3291 = vmatpush3.bf16.msra.mxu0 %v3578_v25 }
  0xeb   :  { %3292 = vmatprep.subr.bf16.mxu0 %v3633_v4 }
  0xee   :  { %3293 = vmatpush3.bf16.msra.mxu0 %v3579_v26 }
  0xef   :  { %3294 = vmatprep.subr.bf16.mxu0 %v3633_v4 }
  0xf2   :  { %3295 = vmatpush3.bf16.msra.mxu0 %v3580_v27 }
 0x108   :  { %v3023_v51 = vpop.f32.mrb[0].mxu0 }
 0x109   :  { %v3024_v52 = vpop.f32.mrb[1].mxu0  ;;  %v3045_v53 = vpop.f32.mrb[0].mxu1 }
 0x10a   :  { %v3025_v54 = vadd.f32 %v3024_v52, %v3023_v51  ;;  %v3026_v55 = vpop.f32.mrb[2].mxu0  ;;  %v3046_v56 = vpop.f32.mrb[1].mxu1 }
 0x10b   :  { %v3027_v57 = vpop.f32.mrb[3].mxu0  ;;  %v3047_v59 = vadd.f32 %v3046_v56, %v3045_v53  ;;  %v3048_v60 = vpop.f32.mrb[2].mxu1 }
 0x10c   :  { %v2214_v58 = vadd.f32 %v3025_v54, %v2805_v37  ;;  %v3028_v61 = vadd.f32 %v3027_v57, %v3026_v55  ;;  %v3049_v62 = vpop.f32.mrb[3].mxu1 }
 0x10d   :  { %v3050_v1 = vadd.f32 %v3049_v62, %v3048_v60 }
 0x10e   :  { %v2255_v63 = vadd.f32 %v3047_v59, %v2214_v58  ;;  %v2217_v0 = vadd.f32 %v3028_v61, %v2805_v37 }
 0x110   :  { %v2258_v2 = vadd.f32 %v3050_v1, %v2217_v0 }
 0x128   :  { %v3067_v7 = vpop.f32.mrb[4].mxu0 }
 0x129   :  { %v3089_v8 = vpop.f32.mrb[4].mxu1  ;;  %v3068_v9 = vpop.f32.mrb[5].mxu0 }
 0x12a   :  { %v3069_v10 = vadd.f32 %v3068_v9, %v3067_v7  ;;  %v3090_v11 = vpop.f32.mrb[5].mxu1  ;;  %v3070_v12 = vpop.f32.mrb[6].mxu0 }
 0x12b   :  { %v3091_v14 = vadd.f32 %v3090_v11, %v3089_v8  ;;  %v3092_v15 = vpop.f32.mrb[6].mxu1  ;;  %v3071_v16 = vpop.f32.mrb[7].mxu0 }
 0x12c   :  { %v2296_v17 = vadd.f32 %v3069_v10, %v2255_v63  ;;  %v3072_v18 = vadd.f32 %v3071_v16, %v3070_v12  ;;  %v3093_v19 = vpop.f32.mrb[7].mxu1 }
 0x12d   :  { %v3094_v20 = vadd.f32 %v3093_v19, %v3092_v15 }
 0x12e   :  { %v2337_v21 = vadd.f32 %v3091_v14, %v2296_v17  ;;  %v2299_v22 = vadd.f32 %v3072_v18, %v2258_v2 }
 0x130   :  { %v2340_v24 = vadd.f32 %v3094_v20, %v2299_v22 }
 0x148   :  { %v3111_v28 = vpop.f32.mrb[8].mxu0 }
 0x149   :  { %v3133_v29 = vpop.f32.mrb[8].mxu1  ;;  %v3112_v30 = vpop.f32.mrb[9].mxu0 }
 0x14a   :  { %v3113_v31 = vadd.f32 %v3112_v30, %v3111_v28  ;;  %v3134_v32 = vpop.f32.mrb[9].mxu1  ;;  %v3114_v33 = vpop.f32.mrb[10].mxu0 }
 0x14b   :  { %v3135_v34 = vadd.f32 %v3134_v32, %v3133_v29  ;;  %v3136_v35 = vpop.f32.mrb[10].mxu1  ;;  %v3115_v36 = vpop.f32.mrb[11].mxu0 }
 0x14c   :  { %v2378_v38 = vadd.f32 %v3113_v31, %v2337_v21  ;;  %v3116_v39 = vadd.f32 %v3115_v36, %v3114_v33  ;;  %v3137_v40 = vpop.f32.mrb[11].mxu1  ;;  %v2998_v31 = vld [vmem:[%s3920_s4] ss:$0 sm:$0xff] }
 0x14d   :  { %v3138_v41 = vadd.f32 %v3137_v40, %v3136_v35 }
 0x14e   :  { %v2419_v42 = vadd.f32 %v3135_v34, %v2378_v38  ;;  %v2381_v43 = vadd.f32 %v3116_v39, %v2340_v24 }
 0x150   :  { %v2422_v44 = vadd.f32 %v3138_v41, %v2381_v43 }
 0x168   :  { %v3155_v45 = vpop.f32.mrb[12].mxu0 }
 0x169   :  { %v3156_v46 = vpop.f32.mrb[13].mxu0  ;;  %v3177_v47 = vpop.f32.mrb[12].mxu1 }
 0x16a   :  { %v3157_v48 = vadd.f32 %v3156_v46, %v3155_v45  ;;  %v3158_v49 = vpop.f32.mrb[14].mxu0  ;;  %v3178_v50 = vpop.f32.mrb[13].mxu1 }
 0x16b   :  { %v3159_v51 = vpop.f32.mrb[15].mxu0  ;;  %v3179_v52 = vadd.f32 %v3178_v50, %v3177_v47  ;;  %v3180_v53 = vpop.f32.mrb[14].mxu1 }
 0x16c   :  { %v2460_v37 = vadd.f32 %v3157_v48, %v2419_v42  ;;  %v3160_v54 = vadd.f32 %v3159_v51, %v3158_v49  ;;  %v3181_v55 = vpop.f32.mrb[15].mxu1 }
 0x16d   :  { %v3182_v58 = vadd.f32 %v3181_v55, %v3180_v53 }
 0x16e   :  { %v2501_v56 = vadd.f32 %v3179_v52, %v2460_v37  ;;  %v2463_v57 = vadd.f32 %v3160_v54, %v2422_v44 }
 0x170   :  { %v2504_v59 = vadd.f32 %v3182_v58, %v2463_v57 }
 0x188   :  { %v3199_v60 = vpop.f32.mrb[16].mxu0 }
 0x189   :  { %v3221_v61 = vpop.f32.mrb[16].mxu1  ;;  %v3200_v62 = vpop.f32.mrb[17].mxu0 }
 0x18a   :  { %v3201_v63 = vadd.f32 %v3200_v62, %v3199_v60  ;;  %v3222_v0 = vpop.f32.mrb[17].mxu1  ;;  %v3202_v1 = vpop.f32.mrb[18].mxu0 }
 0x18b   :  { %v3223_v2 = vadd.f32 %v3222_v0, %v3221_v61  ;;  %v3224_v3 = vpop.f32.mrb[18].mxu1  ;;  %v3203_v4 = vpop.f32.mrb[19].mxu0 }
 0x18c   :  { %v2542_v5 = vadd.f32 %v3201_v63, %v2501_v56  ;;  %v3204_v6 = vadd.f32 %v3203_v4, %v3202_v1  ;;  %v3225_v7 = vpop.f32.mrb[19].mxu1 }
 0x18d   :  { %v3226_v8 = vadd.f32 %v3225_v7, %v3224_v3 }
 0x18e   :  { %v2583_v9 = vadd.f32 %v3223_v2, %v2542_v5  ;;  %v2545_v10 = vadd.f32 %v3204_v6, %v2504_v59 }
 0x190   :  { %v2586_v11 = vadd.f32 %v3226_v8, %v2545_v10 }
 0x1a8   :  { %v3243_v12 = vpop.f32.mrb[20].mxu0 }
 0x1a9   :  { %v3265_v13 = vpop.f32.mrb[20].mxu1  ;;  %v3244_v14 = vpop.f32.mrb[21].mxu0 }
 0x1aa   :  { %v3245_v15 = vadd.f32 %v3244_v14, %v3243_v12  ;;  %v3266_v16 = vpop.f32.mrb[21].mxu1  ;;  %v3246_v17 = vpop.f32.mrb[22].mxu0 }
 0x1ab   :  { %v3267_v18 = vadd.f32 %v3266_v16, %v3265_v13  ;;  %v3268_v19 = vpop.f32.mrb[22].mxu1  ;;  %v3247_v20 = vpop.f32.mrb[23].mxu0 }
 0x1ac   :  { %v2624_v21 = vadd.f32 %v3245_v15, %v2583_v9  ;;  %v3248_v22 = vadd.f32 %v3247_v20, %v3246_v17  ;;  %v3269_v23 = vpop.f32.mrb[23].mxu1 }
 0x1ad   :  { %v3270_v24 = vadd.f32 %v3269_v23, %v3268_v19 }
 0x1ae   :  { %v2665_v25 = vadd.f32 %v3267_v18, %v2624_v21  ;;  %v2627_v26 = vadd.f32 %v3248_v22, %v2586_v11 }
 0x1b0   :  { %v2668_v27 = vadd.f32 %v3270_v24, %v2627_v26  ;;  %v2671_v28 = vmax.f32 %v2665_v25, 0.0 }
 0x1b2   :  { %v2672_v29 = vmax.f32 %v2668_v27, 0.0 }
 0x1b4   :  { %v2673_v30 = vpack.c.bf16 %v2672_v29, %v2671_v28 }
 0x1b6   :  { %3297 = vmatmul.mubr.bf16.vlgmr.msra.gmra.mrb[24].mxu0 %v2673_v30 }
 0x289   :  { %v2779_v32 = vpop.f32.mrb[24].mxu0 }
 0x28a   :  { %v2780_v33 = vadd.f32 %v2998_v31, %v2779_v32  ;;  %v3298_v34 = vpop.f32.mrb[25].mxu0 }
 0x28b   :  { %v2782_v35 = vpop.f32.mrb[26].mxu0 }
 0x28c   :  { %2786 = vst [vmem:[#allocation5] sm:$0xff] %v2780_v33  ;;  %v2783_v36 = vadd.f32 %v2998_v31, %v2782_v35  ;;  %v3299_v38 = vpop.f32.mrb[27].mxu0 }
 0x28e   :  { %2787 = vst [vmem:[#allocation5 + $0x8] sm:$0xff] %v2783_v36 }
 0x28f   :  { %2792 = vsyncadd [#allocation4], 224  ;;  %s3635_s15 = smov [#allocation5]  }
 0x290   :  { %s2793_s16 = sshll.u32 %s3635_s15, 4  ;;  %s2794_s16 = int_to_ptr.vmem [resolvable:$true] %s2793_s16 }
 0x291   :  { %s3603_s17 = scalar_lea.vmem %s2794_s16, 32  ;;  %s3607_s18 = scalar_lea.vmem %s2794_s16, 256 }
 0x292   :  { %p3604_p8 = scmp.ne.s32.totalorder %s2794_s16, %s3603_s17  ;;  %p3608_p9 = scmp.lt.s32.totalorder %s2794_s16, %s2794_s16 }
 0x293   :  { %p3609_p10 = scmp.lt.s32.totalorder %s3607_s18, %s3603_s17 }
 0x295   :  { %p3610_p11 = por %p3609_p10, %p3608_p9 }
 0x297   :  { %p3611_p12 = pnand %p3610_p11, %p3604_p8 }
 0x299   :  { %3614 = shalt.err (!%p3611_p12)
}
 0x29a   :  { %s3615_s20 = scalar_lea.hbm %s3921_s5, 32 }
 0x29b   :  { %p3616_p13 = scmp.ne.s32.totalorder %s3921_s5, %s3615_s20  ;;  %p3619_p0 = scmp.lt.u32.totalorder %s3615_s20, %s3921_s5 }
 0x29d   :  { %p3621_p1 = pnand %p3619_p0, %p3616_p13 }
 0x29f   :  { %3624 = shalt.err (!%p3621_p1)
}
 0x2a0   :  { %s3636_s24 = smov 32   ;;  %s3637_s25 = smov 2  }
 0x2a1   :  { %2799 = dma.vmem_to_hbm [thread:$0]  %s2794_s16, 32, %s3921_s5, [#allocation4], %s3636_s24, %s3636_s24, %s3637_s25  }
 0x2a2   :  { %3627 = dma.done.wait [#allocation4], 256  }
 0x2a3   :  { %3628 = vsyncadd [#allocation4], 4294967040 }
 0x2a4   :  { %2803 = vsyncpa [#allocation3], 1 }
 0x2a5   :  { %2804 = vsyncpa [#allocation4], 1 }

</bundles_post_ra>
